<compile_context>
chip_gen: v7x
topology: tpu7x:2x2x1
jax: 0.10.0
libtpu: 0.0.40
codegen_flags: <defaults>
</compile_context>

<pallas_src>
import jax
import jax.numpy as jnp
from jax import lax
from jax.experimental import pallas as pl
from jax.experimental.pallas import tpu as pltpu

block_size = 32   # max sequence length (tril buffer size in the PyTorch module)
n_embd = 64

_NEG_BIG = -1e30  # large-negative stand-in for -inf (keeps vregs finite)


def _head_kernel(x_ref, w_ref, o_ref):
    # x_ref: (Bb, T, C)  in the matmul dtype (bf16 by default)
    # w_ref: (C, 3H)     fused [Wk | Wq * C**-0.5 | Wv], matmul dtype
    # o_ref: (Bb, T*H)   lane-dense output slab, f32
    Bb, T, C = x_ref.shape
    H = w_ref.shape[1] // 3
    mx_dt = x_ref.dtype            # MXU operand dtype

    # ---- fused K/Q/V projection: one (Bb*T, C) x (C, 3H) MXU matmul --------
    # The reshape only merges the leading (sublane) dims — the lane dim (C) is
    # untouched, so there is no lane relayout.  A rank-3 x rank-2 dot_general
    # is not reliably lowered by Mosaic, so the 2-D dot form is deliberate.
    x2d = x_ref[...].reshape(Bb * T, C)
    kqv = jnp.dot(x2d, w_ref[...], preferred_element_type=jnp.float32)
    kqv = kqv.reshape(Bb, T, 3 * H)
    # NOTE: for H >= 128 (or once multiple heads are fused into one kernel)
    # these slices fall on vreg lane boundaries and become free; at H=16 the
    # lane shifts are a couple of otherwise-idle XLU ops.
    k = kqv[..., 0 * H:1 * H]
    q = kqv[..., 1 * H:2 * H]      # already scaled by C**-0.5 (folded into W)
    v = kqv[..., 2 * H:3 * H]

    # ---- attention scores (bf16 MXU operands, f32 accumulation) ------------
    # Contract on the last dims of both operands: no explicit transpose.
    s = jnp.einsum('bqd,bkd->bqk', q.astype(mx_dt), k.astype(mx_dt),
                   preferred_element_type=jnp.float32)

    # ---- causal softmax: row max over VISIBLE positions only ---------------
    row = lax.broadcasted_iota(jnp.int32, (T, T), 0)
    col = lax.broadcasted_iota(jnp.int32, (T, T), 1)
    causal = (col <= row)[None, :, :]                        # (1, T, T)
    s_vis = jnp.where(causal, s, jnp.float32(_NEG_BIG))
    m = jnp.max(s_vis, axis=-1, keepdims=True)               # finite: diag visible
    p = jnp.exp(s_vis - m)                                   # masked -> exp(-huge) = 0
    denom = jnp.sum(p, axis=-1, keepdims=True)
    p = p * pl.reciprocal(denom, approx=True)                # EUP vrcp (idle slot)

    # dropout(p=0.0) is the identity -> skipped.
    # TODO(synk): for dropout > 0, draw a keep-mask with pltpu.prng_* here.

    out = jnp.einsum('bqk,bkd->bqd', p.astype(mx_dt), v.astype(mx_dt),
                     preferred_element_type=jnp.float32)
    # Lane-dense store: (Bb, T*H) slab (128 lanes at T=8, H=16) instead of a
    # masked 16-lane (Bb, T, H) store.
    o_ref[...] = out.reshape(Bb, T * H).astype(o_ref.dtype)


def fuse_head_weights(wk, wq, wv, *, matmul_dtype=jnp.bfloat16):
    """Build the fused projection weight [Wk | Wq * C**-0.5 | Wv], shape (C, 3H).

    Hoisted out of the forward path so a training loop can store this fused
    array as the parameter instead of re-concatenating it every call.
    """
    C = wk.shape[0]
    scale = jnp.asarray(C, jnp.float32) ** -0.5
    return jnp.concatenate([wk, wq * scale, wv], axis=1).astype(matmul_dtype)


def _pick_batch_block(B, T, C, H, *, vmem_budget=12 * 1024 * 1024):
    """Largest per-step batch block that (a) satisfies Mosaic's block rules for
    the 2-D output slab (Bb == B or Bb % 8 == 0), (b) fits a conservative
    double-buffered VMEM budget (below every generation's default scoped
    limit: 16/32/32 MiB on v5e/v6e/v7x), and (c) prefers >= 2 grid steps so
    the parallel axis can use both v7x TensorCores."""
    # Rough per-batch-element footprint (bytes): bf16 x block + f32 out slab
    # (both double-buffered) + in-kernel f32 temporaries (kqv, scores, probs).
    per_elem = (2 * T * C * 2) + (2 * T * H * 4) + (T * 3 * H * 4) + (2 * T * T * 4)
    cap = max(1, vmem_budget // per_elem)
    valid = [d for d in range(1, B + 1)
             if B % d == 0 and (d == B or d % 8 == 0)]
    fitting = [d for d in valid if d <= cap] or [min(valid)]
    multi_step = [d for d in fitting if B // d >= 2]
    return max(multi_step) if multi_step else max(fitting)


def head_forward_fused(x, wkqv, head_size, *, matmul_dtype=jnp.bfloat16):
    """x: (B, T, C); wkqv: (C, 3H) from fuse_head_weights -> (B, T, H)."""
    B, T, C = x.shape
    H = head_size
    assert T <= block_size and C == n_embd and wkqv.shape == (C, 3 * H)

    Bb = _pick_batch_block(B, T, C, H)
    x_mx = x.astype(matmul_dtype)           # halves x DMA bytes; softmax stays f32

    # TODO(synk): for the full multi-head module, fuse all heads' weights into
    # one (C, nH*3H) operand and emit a single (B, T, nH*H) output so the MXU
    # N-dim and the output lanes are >= 128 without any in-kernel relayout.
    out2d = pl.pallas_call(
        _head_kernel,
        out_shape=jax.ShapeDtypeStruct((B, T * H), x.dtype),
        grid_spec=pltpu.PrefetchScalarGridSpec(
            num_scalar_prefetch=0,
            grid=(B // Bb,),
            in_specs=[
                # If the grid ever gets long enough that the x DMA is exposed,
                # add pipeline_mode=pl.Buffered(3) to this spec.
                pl.BlockSpec((Bb, T, C), lambda b: (b, 0, 0)),
                pl.BlockSpec((C, 3 * H), lambda b: (0, 0)),
            ],
            out_specs=pl.BlockSpec((Bb, T * H), lambda b: (b, 0)),
        ),
        compiler_params=pltpu.CompilerParams(
            dimension_semantics=("parallel",)),
    )(x_mx, wkqv)
    # Row-major metadata reshape back to (B, T, H): free.
    return out2d.reshape(B, T, H)


def head_forward(x, wk, wq, wv, *, matmul_dtype=jnp.bfloat16):
    """Convenience wrapper mirroring the PyTorch Head.forward signature.
    (In a training loop, call fuse_head_weights once and use head_forward_fused.)
    """
    wkqv = fuse_head_weights(wk, wq, wv, matmul_dtype=matmul_dtype)
    return head_forward_fused(x, wkqv, wk.shape[1], matmul_dtype=matmul_dtype)


def _reference(x, wk, wq, wv):
    # Pure-JAX f32 reference mirroring the PyTorch forward.
    B, T, C = x.shape
    k = x @ wk
    q = x @ wq
    v = x @ wv
    wei = (q @ jnp.swapaxes(k, -2, -1)) * (C ** -0.5)
    tril = jnp.tril(jnp.ones((T, T), dtype=bool))
    wei = jnp.where(tril, wei, -jnp.inf)
    wei = jax.nn.softmax(wei, axis=-1)
    return wei @ v


if __name__ == "__main__":
    key = jax.random.PRNGKey(0)
    B, T, C = 2, 8, n_embd
    head_size = 16

    kx, kk, kq, kv = jax.random.split(key, 4)
    x = jax.random.normal(kx, (B, T, C), dtype=jnp.float32)
    # nn.Linear(n_embd, head_size, bias=False) has weight (head_size, n_embd);
    # we store its transpose (C, H) so the kernel computes x @ W.T equivalently.
    scale = (1.0 / C) ** 0.5
    wk = jax.random.uniform(kk, (C, head_size), jnp.float32, -scale, scale)
    wq = jax.random.uniform(kq, (C, head_size), jnp.float32, -scale, scale)
    wv = jax.random.uniform(kv, (C, head_size), jnp.float32, -scale, scale)

    out = head_forward(x, wk, wq, wv)
    out = jax.block_until_ready(out)

    ref = _reference(x, wk, wq, wv)
    assert out.shape == (B, T, head_size)
    # Tolerance accounts for bf16 MXU operands (f32 accumulation) and the EUP
    # approximate reciprocal in the softmax normalization (~1e-4 rel).
    assert jnp.allclose(out, ref, atol=2e-2, rtol=2e-2), (
        f"max err {jnp.max(jnp.abs(out - ref))}"
    )
    print("KERNEL_OK")
</pallas_src>

<mosaic_0001>
module attributes {stable_mosaic.version = 11 : i64} {
  func.func @_head_kernel(%arg0: i32, %arg1: memref<2x8x64xbf16, #tpu.memory_space<vmem>>, %arg2: memref<64x48xbf16, #tpu.memory_space<vmem>>, %arg3: memref<2x128xf32, #tpu.memory_space<vmem>>) attributes {dimension_semantics = [#tpu.dimension_semantics<parallel>], iteration_bounds = array<i64: 1>, scalar_prefetch = 0 : i64, scratch_operands = 0 : i64, tpu.core_type = #tpu.core_type<tc>, window_params = [{transform_indices = @transform_0, window_bounds = array<i64: 2, 8, 64>}, {pipeline_mode = #tpu.pipeline_mode<synchronous>, transform_indices = @transform_1, window_bounds = array<i64: 64, 48>}, {transform_indices = @transform_2, window_bounds = array<i64: 2, 128>}]} {
    %c0 = arith.constant 0 : index
    %c0_0 = arith.constant 0 : index
    %c0_1 = arith.constant 0 : index
    %0 = vector.load %arg1[%c0, %c0_0, %c0_1] : memref<2x8x64xbf16, #tpu.memory_space<vmem>>, vector<2x8x64xbf16>
    %1 = vector.shape_cast %0 : vector<2x8x64xbf16> to vector<16x64xbf16>
    %c0_2 = arith.constant 0 : index
    %c0_3 = arith.constant 0 : index
    %2 = vector.load %arg2[%c0_2, %c0_3] : memref<64x48xbf16, #tpu.memory_space<vmem>>, vector<64x48xbf16>
    %cst = arith.constant dense<0.000000e+00> : vector<16x48xf32>
    %3 = tpu.matmul %1, %2, %cst {dimension_numbers = #tpu.dot_dimension_numbers<[1], [0], [0], [1], [0, 0, 1, 1], [], []>} : vector<16x64xbf16>, vector<64x48xbf16>, vector<16x48xf32> -> vector<16x48xf32>
    %4 = vector.shape_cast %3 : vector<16x48xf32> to vector<2x8x48xf32>
    %5 = vector.extract_strided_slice %4 {offsets = [0, 0, 0], sizes = [2, 8, 16], strides = [1, 1, 1]} : vector<2x8x48xf32> to vector<2x8x16xf32>
    %6 = vector.extract_strided_slice %4 {offsets = [0, 0, 16], sizes = [2, 8, 16], strides = [1, 1, 1]} : vector<2x8x48xf32> to vector<2x8x16xf32>
    %7 = vector.extract_strided_slice %4 {offsets = [0, 0, 32], sizes = [2, 8, 16], strides = [1, 1, 1]} : vector<2x8x48xf32> to vector<2x8x16xf32>
    %8 = arith.truncf %6 : vector<2x8x16xf32> to vector<2x8x16xbf16>
    %9 = arith.truncf %5 : vector<2x8x16xf32> to vector<2x8x16xbf16>
    "tpu.trace_start"() <{level = 10 : i32, message = "bqd,bkd->bqk"}> : () -> ()
    %cst_4 = arith.constant dense<0.000000e+00> : vector<2x8x8xf32>
    %10 = tpu.matmul %8, %9, %cst_4 {dimension_numbers = #tpu.dot_dimension_numbers<[2], [2], [1], [1], [0, 0, 0, 1, 1, 1], [0], [0]>} : vector<2x8x16xbf16>, vector<2x8x16xbf16>, vector<2x8x8xf32> -> vector<2x8x8xf32>
    "tpu.trace_stop"() : () -> ()
    %11 = tpu.iota {dimensions = array<i32: 0>} : vector<8x8xi32>
    %12 = tpu.iota {dimensions = array<i32: 1>} : vector<8x8xi32>
    %13 = arith.cmpi sle, %12, %11 : vector<8x8xi32>
    %14 = vector.shape_cast %13 : vector<8x8xi1> to vector<1x8x8xi1>
    %cst_5 = arith.constant -1.000000e+30 : f32
    %15 = vector.shape_cast %14 : vector<1x8x8xi1> to vector<1x8x8xi1>
    %16 = vector.broadcast %15 : vector<1x8x8xi1> to vector<2x8x8xi1>
    %17 = vector.broadcast %cst_5 : f32 to vector<2x8x8xf32>
    %18 = arith.select %16, %10, %17 : vector<2x8x8xi1>, vector<2x8x8xf32>
    %cst_6 = arith.constant dense<0xFF800000> : vector<2x8xf32>
    %19 = vector.multi_reduction <maximumf>, %18, %cst_6 [2] : vector<2x8x8xf32> to vector<2x8xf32>
    %20 = vector.shape_cast %19 : vector<2x8xf32> to vector<2x8x1xf32>
    %21 = vector.broadcast %20 : vector<2x8x1xf32> to vector<2x8x8xf32>
    %22 = arith.subf %18, %21 : vector<2x8x8xf32>
    %23 = math.exp %22 : vector<2x8x8xf32>
    %cst_7 = arith.constant dense<0.000000e+00> : vector<2x8xf32>
    %24 = vector.multi_reduction <add>, %23, %cst_7 [2] : vector<2x8x8xf32> to vector<2x8xf32>
    %25 = vector.shape_cast %24 : vector<2x8xf32> to vector<2x8x1xf32>
    %26 = tpu.reciprocal %25 {approx = true} : vector<2x8x1xf32> -> vector<2x8x1xf32>
    %27 = vector.broadcast %26 : vector<2x8x1xf32> to vector<2x8x8xf32>
    %28 = arith.mulf %23, %27 : vector<2x8x8xf32>
    %29 = arith.truncf %28 : vector<2x8x8xf32> to vector<2x8x8xbf16>
    %30 = arith.truncf %7 : vector<2x8x16xf32> to vector<2x8x16xbf16>
    "tpu.trace_start"() <{level = 10 : i32, message = "bqk,bkd->bqd"}> : () -> ()
    %cst_8 = arith.constant dense<0.000000e+00> : vector<2x8x16xf32>
    %31 = tpu.matmul %29, %30, %cst_8 {dimension_numbers = #tpu.dot_dimension_numbers<[2], [1], [1], [2], [0, 0, 0, 1, 1, 2], [0], [0]>} : vector<2x8x8xbf16>, vector<2x8x16xbf16>, vector<2x8x16xf32> -> vector<2x8x16xf32>
    "tpu.trace_stop"() : () -> ()
    %32 = vector.shape_cast %31 : vector<2x8x16xf32> to vector<2x128xf32>
    %c0_9 = arith.constant 0 : index
    %c0_10 = arith.constant 0 : index
    %33 = vector.load %arg3[%c0_9, %c0_10] : memref<2x128xf32, #tpu.memory_space<vmem>>, vector<2x128xf32>
    tpu.vector_store %arg3[%c0_9, %c0_10], %32 {strides = array<i32>} : memref<2x128xf32, #tpu.memory_space<vmem>>, vector<2x128xf32>,
    return
  }
  func.func @transform_0(%arg0: i32) -> (i32, i32, i32) {
    %c0_i32 = arith.constant 0 : i32
    %c0_i32_0 = arith.constant 0 : i32
    %c0_i32_1 = arith.constant 0 : i32
    return %arg0, %c0_i32, %c0_i32_0 : i32, i32, i32
  }
  func.func @transform_1(%arg0: i32) -> (i32, i32) {
    %c0_i32 = arith.constant 0 : i32
    %c0_i32_0 = arith.constant 0 : i32
    %c0_i32_1 = arith.constant 0 : i32
    return %c0_i32, %c0_i32_0 : i32, i32
  }
  func.func @transform_2(%arg0: i32) -> (i32, i32) {
    %c0_i32 = arith.constant 0 : i32
    %c0_i32_0 = arith.constant 0 : i32
    return %arg0, %c0_i32 : i32, i32
  }
}

</mosaic_0001>

<bundles_post_ra>
// kernel: tpu_custom_call.1
= control target key start
LH: loop header
LB: loop body
LE: loop exit
PB: predicated region body
PF: predicated region fallthrough
CT: control target
= control target key end

     0   :  { %v558_v1 = vmov 0.0   ;;  %vm559_vm0 = vmmov 0   ;;  %s662_s0 = inlined_call_operand.vmem [shape: bf16[2,8,64], index: 0, kind: input, shape index: {}]   ;;  %s663_s1 = inlined_call_operand.vmem [shape: bf16[64,48], index: 1, kind: input, shape index: {}]   ;;  %s664_s2 = inlined_call_operand.hbm [shape: f32[2,128], index: 2, kind: output, shape index: {}]  }
   0x1   :  { %v521_v0 = vld [vmem:[%s663_s1] sm:$0xff]   ;;  %473 = vmatprep.subr.bf16.mxu0 %v558_v1  ;;  %485 = vmatprep.subr.bf16.mxu1 %v558_v1  ;;  %v522_v2 = vld [vmem:[%s663_s1 + $0x8] sm:$0xff]  }
   0x2   :  { %474 = vmatpush3.bf16.msra.mxu0 %v521_v0  ;;  %481 = vmatprep.mubr.msk.bf16.mxu0 %vm559_vm0, %v558_v1 }
   0x3   :  { %475 = vmatprep.subr.bf16.mxu0 %v558_v1  ;;  %487 = vmatprep.mubr.msk.bf16.mxu1 %vm559_vm0, %v558_v1 }
   0x4   :  { %7 = vsyncpa [#allocation3], 0  ;;  %v523_v3 = vld [vmem:[%s663_s1 + $0x10] sm:$0xff]   ;;  %v524_v4 = vld [vmem:[%s663_s1 + $0x18] sm:$0xff]   ;;  %vm52_vm1 = vcmask 523264   ;;  %vm102_vm2 = vcmask 130048   ;;  %v198_v16 = vlaneseq }
   0x5   :  { %v525_v5 = vld [vmem:[%s662_s0] sm:$0xff]   ;;  %s560_s1 = smov 112   ;;  %vm207_vm4 = vcmask 64512   ;;  %s561_s0 = smov 96   ;;  %vm237_vm5 = vcmask 1043456   ;;  %vm424_vm6 = vcmask 261120  }
   0x6   :  { %476 = vmatpush3.bf16.msra.mxu0 %v522_v2  ;;  %v625_v17 = vshrl.u32 %v198_v16, 7  ;;  %v201_v18 = vand.u32 127, %v198_v16  ;;  %v562_v53 = vmov 1983009808   ;;  %v563_v56 = vmov 1934713408  }
   0x7   :  { %477 = vmatprep.subr.bf16.mxu0 %v558_v1  ;;  %v331_v54 = vunpack.c.l.s4 %v562_v53  ;;  %v362_v57 = vunpack.c.l.s4 %v563_v56  ;;  %s564_s19 = smov 32   ;;  %s565_s20 = smov 48   ;;  %vm426_vm7 = vcmask 392192   ;;  %vm429_vm8 = vcmask 654336  }
   0x8   :  { %vm202_vm3 = vcmp.le.s32.totalorder %v201_v18, %v625_v17  ;;  %s566_s21 = smov 16   ;;  %s567_s22 = smov 64   ;;  %vm431_vm9 = vcmask 785408   ;;  %vm433_vm10 = vcmask 916480  }
   0x9   :  { %v332_v58 = vunpack.c.0.s8 %v331_v54  ;;  %v363_v62 = vunpack.c.0.s8 %v362_v57  ;;  %s568_s23 = smov 80   ;;  %s569_s24 = smov [#allocation2]  }
   0xa   :  { %478 = vmatpush3.bf16.msra.mxu0 %v523_v3  ;;  %s442_s25 = sshll.u32 %s569_s24, 4  ;;  %s443_s25 = int_to_ptr.vmem [resolvable:$true] %s442_s25 }
   0xb   :  { %479 = vmatprep.subr.bf16.mxu0 %v558_v1  ;;  %v335_v63 = vsub.s32 %v332_v58, %v625_v17  ;;  %v366_v3 = vsub.s32 %v363_v62, %v625_v17  ;;  %s534_s26 = scalar_lea.vmem %s443_s25, 32  ;;  %p539_p1 = scmp.lt.s32.totalorder %s443_s25, %s443_s25 }
   0xc   :  { %p535_p0 = scmp.ne.s32.totalorder %s443_s25, %s534_s26  ;;  %p540_p2 = scmp.lt.s32.totalorder %s534_s26, %s534_s26 }
   0xe   :  { %480 = vmatpush3.bf16.msra.mxu0 %v524_v4  ;;  %p541_p3 = por %p540_p2, %p539_p1 }
   0xf   :  { %497 = vmatprep.subr.bf16.mxu0 %v558_v1 }
  0x10   :  { %p542_p4 = pnand %p541_p3, %p535_p0 }
  0x11   :  { %482 = vmatmul.mubr.msk.bf16.vlgmr.msra.gmra.mrb[0].mxu0 %vm52_vm1, %v525_v5 }
  0x12   :  { %499 = vmatprep.mubr.msk.bf16.mxu0 %vm559_vm0, %v558_v1 }
  0xe4   :  { %v90_v6 = vpop.f32.mrb[0].mxu0 }
  0xe5   :  { %v97_v7 = vpack.c.bf16 %v90_v6, %v90_v6  ;;  %v483_v8 = vpop.f32.mrb[1].mxu0 }
  0xe6   :  { %v93_v9 = vpop.f32.mrb[2].mxu0 }
  0xe7   :  { %100 = vrot.lane.b32.xlu0 %v97_v7, %s560_s1  ;;  %v484_v10 = vpop.f32.mrb[3].mxu0  ;;  %v107_v11 = vsel %vm102_vm2, %v97_v7, 0  ;;  %v98_v12 = vpack.c.bf16 %v93_v9, %v93_v9 }
  0xe8   :  { %486 = vmatpush3.bf16.xpose.msra.mxu1 %v107_v11 }
  0xe9   :  { %491 = vmatprep.subr.bf16.mxu1 %v558_v1  ;;  %v156_v14 = vsel %vm102_vm2, %v98_v12, 0 }
  0xeb   :  { %150 = vrot.lane.b32.xlu0 %v98_v12, %s560_s1 }
 0x159   :  { %v101_v13 = vpop.permute.xlu0 %100 }
 0x15a   :  { %488 = vmatmul.mubr.msk.bf16.vlgmr.msra.gmra.mrb[0].mxu1 %vm102_vm2, %v101_v13 }
 0x15b   :  { %492 = vmatpush3.bf16.xpose.msra.mxu1 %v156_v14  ;;  %493 = vmatprep.mubr.msk.bf16.mxu1 %vm559_vm0, %v558_v1 }
 0x15c   :  { %503 = vmatprep.subr.bf16.mxu1 %v558_v1 }
 0x15d   :  { %v151_v15 = vpop.permute.xlu0 %150 }
 0x162   :  { %494 = vmatmul.mubr.msk.bf16.vlgmr.msra.gmra.mrb[4].mxu1 %vm102_vm2, %v151_v15 }
 0x163   :  { %505 = vmatprep.mubr.msk.bf16.mxu1 %vm559_vm0, %v558_v1 }
 0x22d   :  { %v143_v19 = vpop.f32.mrb[0].mxu1 }
 0x22e   :  { %v205_v20 = vsel %vm202_vm3, %v143_v19, -1e+30  ;;  %v489_v21 = vpop.f32.mrb[1].mxu1 }
 0x22f   :  { %v146_v22 = vpop.f32.mrb[2].mxu1  ;;  %v208_v23 = vsel %vm207_vm4, %v205_v20, -inf }
 0x230   :  { %209 = vmax.xlane.f32.xlu1 %v208_v23  ;;  %v490_v24 = vpop.f32.mrb[3].mxu1 }
 0x235   :  { %v192_v25 = vpop.f32.mrb[4].mxu1 }
 0x236   :  { %v206_v26 = vsel %vm202_vm3, %v192_v25, -1e+30  ;;  %v495_v27 = vpop.f32.mrb[5].mxu1 }
 0x237   :  { %v195_v28 = vpop.f32.mrb[6].mxu1  ;;  %v211_v29 = vsel %vm207_vm4, %v206_v26, -inf }
 0x238   :  { %212 = vmax.xlane.f32.xlu1 %v211_v29  ;;  %v496_v30 = vpop.f32.mrb[7].mxu1 }
 0x249   :  { %232 = vrot.lane.b32.xlu1 %v97_v7, %s561_s0 }
 0x2bd   :  { %v210_v31 = vpop.xlane.xlu1 %209 }
 0x2be   :  { %v214_v32 = vsub.f32 %v205_v20, %v210_v31 }
 0x2c0   :  { %v216_v33 = vmul.f32 1.442695, %v214_v32 }
 0x2c2   :  { %526 = vpow2.f32 %v216_v33 }
 0x2c5   :  { %v213_v34 = vpop.xlane.xlu1 %212 }
 0x2c6   :  { %v215_v35 = vsub.f32 %v206_v26, %v213_v34 }
 0x2c8   :  { %v218_v36 = vmul.f32 1.442695, %v215_v35 }
 0x2c9   :  { %v233_v37 = vpop.permute.xlu1 %232 }
 0x2ca   :  { %528 = vpow2.f32 %v218_v36  ;;  %v239_v38 = vsel %vm237_vm5, %v233_v37, 0 }
 0x2cb   :  { %498 = vmatpush3.bf16.msra.mxu0 %v239_v38 }
 0x2cc   :  { %v527_v39 = vpop.eup %526 }
 0x2cd   :  { %v220_v40 = vsel %vm207_vm4, %v527_v39, 0.0 }
 0x2ce   :  { %221 = vadd.xlane.f32.xlu0 %v220_v40 }
 0x2d4   :  { %v529_v41 = vpop.eup %528 }
 0x2d5   :  { %v223_v42 = vsel %vm207_vm4, %v529_v41, 0.0 }
 0x2d6   :  { %224 = vadd.xlane.f32.xlu1 %v223_v42 }
 0x2e7   :  { %281 = vrot.lane.b32.xlu1 %v98_v12, %s561_s0 }
 0x35b   :  { %v222_v43 = vpop.xlane.xlu0 %221 }
 0x35c   :  { %530 = vrcp.f32 %v222_v43 }
 0x363   :  { %v225_v44 = vpop.xlane.xlu1 %224 }
 0x364   :  { %532 = vrcp.f32 %v225_v44 }
 0x366   :  { %v531_v45 = vpop.eup %530 }
 0x367   :  { %v228_v46 = vmul.f32 %v531_v45, %v527_v39  ;;  %v282_v47 = vpop.permute.xlu1 %281 }
 0x368   :  { %v287_v48 = vsel %vm237_vm5, %v282_v47, 0 }
 0x369   :  { %504 = vmatpush3.bf16.msra.mxu1 %v287_v48  ;;  %v230_v49 = vpack.c.bf16 %v228_v46, %v228_v46 }
 0x36b   :  { %500 = vmatmul.mubr.msk.bf16.vlgmr.msra.gmra.mrb[4].mxu0 %vm207_vm4, %v230_v49 }
 0x36e   :  { %v533_v50 = vpop.eup %532 }
 0x36f   :  { %v229_v51 = vmul.f32 %v533_v50, %v529_v41 }
 0x371   :  { %v231_v52 = vpack.c.bf16 %v229_v51, %v229_v51 }
 0x373   :  { %506 = vmatmul.mubr.msk.bf16.vlgmr.msra.gmra.mrb[8].mxu1 %vm207_vm4, %v231_v52 }
 0x43e   :  { %v275_v55 = vpop.f32.mrb[4].mxu0 }
 0x43f   :  { %v501_v59 = vpop.f32.mrb[5].mxu0  ;;  %v329_v0 = vcombine.high %v275_v55, %v558_v1  ;;  %v336_v4 = vrot.slane %v275_v55, %v335_v63 }
 0x440   :  { %v278_v60 = vpop.f32.mrb[6].mxu0 }
 0x441   :  { %v502_v61 = vpop.f32.mrb[7].mxu0  ;;  %v343_v9 = vrot.slane %v329_v0, %v335_v63 }
 0x446   :  { %v323_v2 = vpop.f32.mrb[8].mxu1 }
 0x447   :  { %v344_v5 = vcombine.high %v323_v2, %v558_v1  ;;  %v351_v6 = vrot.slane %v323_v2, %v335_v63  ;;  %v507_v7 = vpop.f32.mrb[9].mxu1 }
 0x448   :  { %v326_v8 = vpop.f32.mrb[10].mxu1 }
 0x449   :  { %v358_v10 = vrot.slane %v344_v5, %v335_v63  ;;  %v359_v11 = vcombine.low %v336_v4, %v351_v6  ;;  %v360_v12 = vcombine.high %v336_v4, %v351_v6  ;;  %v508_v13 = vpop.f32.mrb[11].mxu1 }
 0x44b   :  { %v367_v14 = vrot.slane %v359_v11, %v366_v3  ;;  %v375_v15 = vcombine.low %v343_v9, %v358_v10  ;;  %v376_v16 = vcombine.high %v343_v9, %v358_v10  ;;  %v374_v18 = vrot.slane %v360_v12, %v366_v3 }
 0x44d   :  { %400 = vrot.lane.b32.xlu1 %v374_v18, %s564_s19  ;;  %v392_v19 = vcombine.high %v374_v18, %v558_v1  ;;  %v391_v17 = vcombine.high %v367_v14, %v558_v1  ;;  %v383_v20 = vrot.slane %v375_v15, %v366_v3  ;;  %v390_v21 = vrot.slane %v376_v16, %v366_v3 }
 0x44f   :  { %404 = vrot.lane.b32.xlu0 %v392_v19, %s565_s20  ;;  %v393_v22 = vcombine.high %v383_v20, %v558_v1  ;;  %v394_v23 = vcombine.high %v390_v21, %v558_v1 }
 0x451   :  { %396 = vrot.lane.b32.xlu1 %v391_v17, %s566_s21 }
 0x455   :  { %408 = vrot.lane.b32.xlu1 %v383_v20, %s567_s22 }
 0x459   :  { %416 = vrot.lane.b32.xlu1 %v390_v21, %s561_s0 }
 0x45d   :  { %412 = vrot.lane.b32.xlu1 %v393_v22, %s568_s23 }
 0x461   :  { %420 = vrot.lane.b32.xlu1 %v394_v23, %s560_s1 }
 0x4bf   :  { %v401_v24 = vpop.permute.xlu1 %400 }
 0x4c1   :  { %v405_v29 = vpop.permute.xlu0 %404 }
 0x4c3   :  { %v397_v25 = vpop.permute.xlu1 %396 }
 0x4c4   :  { %v423_v26 = vsel %vm102_vm2, %v367_v14, %v397_v25 }
 0x4c5   :  { %v425_v28 = vsel %vm424_vm6, %v423_v26, %v401_v24 }
 0x4c6   :  { %v427_v31 = vsel %vm426_vm7, %v425_v28, %v405_v29 }
 0x4c7   :  { %v409_v27 = vpop.permute.xlu1 %408 }
 0x4c8   :  { %v428_v32 = vsel %vm52_vm1, %v427_v31, %v409_v27 }
 0x4cb   :  { %v417_v30 = vpop.permute.xlu1 %416 }
 0x4cf   :  { %v413_v33 = vpop.permute.xlu1 %412 }
 0x4d0   :  { %v430_v34 = vsel %vm429_vm8, %v428_v32, %v413_v33 }
 0x4d1   :  { %v432_v1 = vsel %vm431_vm9, %v430_v34, %v417_v30 }
 0x4d3   :  { %v421_v35 = vpop.permute.xlu1 %420 }
 0x4d4   :  { %v434_v36 = vsel %vm433_vm10, %v432_v1, %v421_v35 }
 0x4d5   :  { %435 = vst [vmem:[#allocation2] sm:$0x3] %v434_v36 }
 0x4d6   :  { %545 = shalt.err (!%p542_p4)
}
 0x4d7   :  { %s546_s29 = scalar_lea.hbm %s664_s2, 32 }
 0x4d8   :  { %p547_p5 = scmp.ne.s32.totalorder %s664_s2, %s546_s29  ;;  %p550_p6 = scmp.lt.u32.totalorder %s546_s29, %s664_s2 }
 0x4da   :  { %p552_p7 = pnand %p550_p6, %p547_p5 }
 0x4dc   :  { %555 = shalt.err (!%p552_p7)
}
 0x4dd   :  { %445 = dma.vmem_to_hbm [thread:$0]  %s443_s25, 32, %s664_s2, [#allocation3]  }
 0x4de   :  { %556 = dma.done.wait [#allocation3], 32  }
 0x4df   :  { %557 = vsyncadd [#allocation3], 4294967264 }
 0x4e0   :  { %449 = vsyncpa [#allocation3], 1 }

</bundles_post_ra>
